<compile_context>
chip_gen: v6e
topology: v6e:2x2x1
jax: 0.10.0
libtpu: 0.0.40
codegen_flags: <defaults>
</compile_context>

<pallas_src>
import jax
import jax.numpy as jnp
from jax import lax
from jax.experimental import pallas as pl
from jax.experimental.pallas import tpu as pltpu


def _round_up(x: int, m: int) -> int:
    return ((x + m - 1) // m) * m


def fc_relu_kernel_acc(x_ref, w_ref, b_ref, o_ref, acc_ref):
    """One (tm, tn) output tile, accumulated over the K grid axis.

    x_ref:   (tm, tk)  node-major activations
    w_ref:   (tn, tk)  weights in natural (classes, features) layout
    b_ref:   (tn, tm)  bias in natural (classes, nodes) layout
    o_ref:   (tm, tn)
    acc_ref: (tm, tn)  f32 accumulator, resident across the K axis
    """
    k = pl.program_id(2)

    @pl.when(k == 0)
    def _():
        acc_ref[...] = jnp.zeros_like(acc_ref)

    # X @ W^T without materializing W.T: contract dim 1 of X against dim 1 of W.
    acc_ref[...] += lax.dot_general(
        x_ref[...], w_ref[...],
        dimension_numbers=(((1,), (1,)), ((), ())),
        preferred_element_type=jnp.float32,
    )

    @pl.when(k == pl.num_programs(2) - 1)
    def _():
        # Bias tile arrives as (tn, tm); transpose in-kernel (XLU slot is idle here).
        bias = b_ref[...].astype(jnp.float32).T
        o_ref[...] = jnp.maximum(acc_ref[...] + bias, 0.0).astype(o_ref.dtype)


def fc_relu_kernel_fused(x_ref, w_ref, b_ref, o_ref):
    """Single-K-step variant: no accumulator scratch, straight to the output tile."""
    acc = lax.dot_general(
        x_ref[...], w_ref[...],
        dimension_numbers=(((1,), (1,)), ((), ())),
        preferred_element_type=jnp.float32,
    )
    bias = b_ref[...].astype(jnp.float32).T
    o_ref[...] = jnp.maximum(acc + bias, 0.0).astype(o_ref.dtype)


def fully_connected_relu(X, W, b, *, tm=256, tn=256, tk=512):
    """X: (num_nodes, num_features), W: (num_classes, num_features),
    b: (num_classes, num_nodes).  Returns (num_nodes, num_classes)."""
    M, K = X.shape
    N, Kw = W.shape
    assert Kw == K and b.shape == (N, M)

    # Tiles are multiples of 128 so every block's last two dims satisfy the
    # (8, 128) constraint (including the bias block whose last dim is tm),
    # clamped down for small problems.
    tm = min(tm, _round_up(M, 128))
    tn = min(tn, _round_up(N, 128))
    tk = min(tk, _round_up(K, 128))
    Mp, Np, Kp = _round_up(M, tm), _round_up(N, tn), _round_up(K, tk)

    # Zero-pad once so the output is lane-dense and all operands tile evenly;
    # padded rows/cols contribute zeros and are sliced off afterwards.
    Xp = X if (Mp == M and Kp == K) else jnp.pad(X, ((0, Mp - M), (0, Kp - K)))
    Wp = W if (Np == N and Kp == K) else jnp.pad(W, ((0, Np - N), (0, Kp - K)))
    bp = b if (Np == N and Mp == M) else jnp.pad(b, ((0, Np - N), (0, Mp - M)))

    kt = Kp // tk
    in_specs = [
        pl.BlockSpec((tm, tk), lambda i, j, k: (i, k)),  # X
        pl.BlockSpec((tn, tk), lambda i, j, k: (j, k)),  # W (no wrapper .T)
        pl.BlockSpec((tn, tm), lambda i, j, k: (j, i)),  # b (no wrapper .T)
    ]
    out_spec = pl.BlockSpec((tm, tn), lambda i, j, k: (i, j))

    if kt == 1:
        kernel = fc_relu_kernel_fused
        scratch_shapes = []
    else:
        kernel = fc_relu_kernel_acc
        scratch_shapes = [pltpu.VMEM((tm, tn), jnp.float32)]

    out = pl.pallas_call(
        kernel,
        out_shape=jax.ShapeDtypeStruct((Mp, Np), X.dtype),
        grid_spec=pltpu.PrefetchScalarGridSpec(
            num_scalar_prefetch=0,
            grid=(Mp // tm, Np // tn, kt),
            in_specs=in_specs,
            out_specs=out_spec,
            scratch_shapes=scratch_shapes,
        ),
        compiler_params=pltpu.CompilerParams(
            # M/N are independent (shardable across v7x TensorCores); K reduces.
            dimension_semantics=("parallel", "parallel", "arbitrary"),
        ),
    )(Xp, Wp, bp)

    return out[:M, :N]


if __name__ == "__main__":
    num_classes = 4
    num_features = 32
    num_nodes = 8

    key = jax.random.PRNGKey(0)
    kW, kb, kX = jax.random.split(key, 3)

    # Deterministic synthetic parameters matching the module's shapes:
    #   W ~ Normal(mean=1, std=1/(num_classes*num_features)) -> (num_classes, num_features)
    #   b ~ Normal(mean=1, std=1/(num_classes*num_nodes))     -> (num_classes, num_nodes)
    W = (1.0 + jax.random.normal(kW, (num_classes, num_features), jnp.float32)
         / (num_classes * num_features))
    b = (1.0 + jax.random.normal(kb, (num_classes, num_nodes), jnp.float32)
         / (num_classes * num_nodes))
    X = jax.random.normal(kX, (num_nodes, num_features), jnp.float32)

    out = fully_connected_relu(X, W, b)
    out = jax.block_until_ready(out)

    # Reference check in plain JAX (same math as the PyTorch forward).
    ref = jnp.maximum(W @ X.T + b, 0.0).T
    assert out.shape == (num_nodes, num_classes)
    assert jnp.allclose(out, ref, atol=1e-5, rtol=1e-5)

    print("KERNEL_OK")
</pallas_src>

<mosaic_0001>
module attributes {stable_mosaic.version = 11 : i64} {
  func.func @fc_relu_kernel_fused(%arg0: i32, %arg1: i32, %arg2: i32, %arg3: memref<128x128xf32, #tpu.memory_space<vmem>>, %arg4: memref<128x128xf32, #tpu.memory_space<vmem>>, %arg5: memref<128x128xf32, #tpu.memory_space<vmem>>, %arg6: memref<128x128xf32, #tpu.memory_space<vmem>>) attributes {dimension_semantics = [#tpu.dimension_semantics<parallel>, #tpu.dimension_semantics<parallel>, #tpu.dimension_semantics<arbitrary>], iteration_bounds = array<i64: 1, 1, 1>, scalar_prefetch = 0 : i64, scratch_operands = 0 : i64, tpu.core_type = #tpu.core_type<tc>, window_params = [{transform_indices = @transform_0, window_bounds = array<i64: 128, 128>}, {transform_indices = @transform_1, window_bounds = array<i64: 128, 128>}, {transform_indices = @transform_2, window_bounds = array<i64: 128, 128>}, {transform_indices = @transform_3, window_bounds = array<i64: 128, 128>}]} {
    %c0 = arith.constant 0 : index
    %c0_0 = arith.constant 0 : index
    %0 = vector.load %arg3[%c0, %c0_0] : memref<128x128xf32, #tpu.memory_space<vmem>>, vector<128x128xf32>
    %c0_1 = arith.constant 0 : index
    %c0_2 = arith.constant 0 : index
    %1 = vector.load %arg4[%c0_1, %c0_2] : memref<128x128xf32, #tpu.memory_space<vmem>>, vector<128x128xf32>
    %cst = arith.constant dense<0.000000e+00> : vector<128x128xf32>
    %2 = tpu.matmul %0, %1, %cst {dimension_numbers = #tpu.dot_dimension_numbers<[1], [1], [0], [0], [0, 0, 1, 0], [], []>} : vector<128x128xf32>, vector<128x128xf32>, vector<128x128xf32> -> vector<128x128xf32>
    %c0_3 = arith.constant 0 : index
    %c0_4 = arith.constant 0 : index
    %3 = vector.load %arg5[%c0_3, %c0_4] : memref<128x128xf32, #tpu.memory_space<vmem>>, vector<128x128xf32>
    %4 = tpu.transpose %3, [1, 0] : vector<128x128xf32> -> vector<128x128xf32>
    %5 = arith.addf %2, %4 : vector<128x128xf32>
    %cst_5 = arith.constant 0.000000e+00 : f32
    %6 = vector.broadcast %cst_5 : f32 to vector<128x128xf32>
    %7 = arith.maximumf %5, %6 : vector<128x128xf32>
    %c0_6 = arith.constant 0 : index
    %c0_7 = arith.constant 0 : index
    %8 = vector.load %arg6[%c0_6, %c0_7] : memref<128x128xf32, #tpu.memory_space<vmem>>, vector<128x128xf32>
    tpu.vector_store %arg6[%c0_6, %c0_7], %7 {strides = array<i32>} : memref<128x128xf32, #tpu.memory_space<vmem>>, vector<128x128xf32>,
    return
  }
  func.func @transform_0(%arg0: i32, %arg1: i32, %arg2: i32) -> (i32, i32) {
    %c0_i32 = arith.constant 0 : i32
    return %arg0, %arg2 : i32, i32
  }
  func.func @transform_1(%arg0: i32, %arg1: i32, %arg2: i32) -> (i32, i32) {
    %c0_i32 = arith.constant 0 : i32
    return %arg1, %arg2 : i32, i32
  }
  func.func @transform_2(%arg0: i32, %arg1: i32, %arg2: i32) -> (i32, i32) {
    %c0_i32 = arith.constant 0 : i32
    return %arg1, %arg0 : i32, i32
  }
  func.func @transform_3(%arg0: i32, %arg1: i32, %arg2: i32) -> (i32, i32) {
    %c0_i32 = arith.constant 0 : i32
    return %arg0, %arg1 : i32, i32
  }
}

</mosaic_0001>

<bundles_post_ra>
// kernel: tpu_custom_call.1
= control target key start
LH: loop header
LB: loop body
LE: loop exit
PB: predicated region body
PF: predicated region fallthrough
CT: control target
= control target key end

     0   :  { %8 = vsyncpa [#allocation3], 0  ;;  %s596_s0 = inlined_call_operand.hbm [shape: f32[128,128], index: 0, kind: input, shape index: {}]   ;;  %s597_s1 = inlined_call_operand.hbm [shape: f32[128,128], index: 1, kind: input, shape index: {}]   ;;  %s598_s2 = inlined_call_operand.hbm [shape: f32[128,128], index: 2, kind: input, shape index: {}]   ;;  %s599_s3 = inlined_call_operand.hbm [shape: f32[128,128], index: 3, kind: output, shape index: {}]  }
   0x1   :  { %9 = vsyncpa [#allocation6], 0 }
   0x2   :  { %10 = vsyncpa [#allocation4], 0  ;;  %s543_s12 = smov [#allocation5]   ;;  %s544_s14 = smov [#allocation2]  }
   0x3   :  { %s28_s13 = sshll.u32 %s543_s12, 4  ;;  %s16_s15 = sshll.u32 %s544_s14, 4  ;;  %s29_s13 = int_to_ptr.vmem [resolvable:$true] %s28_s13  ;;  %s17_s15 = int_to_ptr.vmem [resolvable:$true] %s16_s15 }
   0x4   :  { %s465_s16 = scalar_lea.vmem %s29_s13, 2048  ;;  %p470_p1 = scmp.lt.s32.totalorder %s29_s13, %s29_s13 }
   0x5   :  { %p466_p0 = scmp.ne.s32.totalorder %s29_s13, %s465_s16  ;;  %p471_p2 = scmp.lt.s32.totalorder %s465_s16, %s465_s16 }
   0x7   :  { %p472_p3 = por %p471_p2, %p470_p1 }
   0x9   :  { %p473_p4 = pnand %p472_p3, %p466_p0 }
   0xb   :  { %476 = shalt.err (!%p473_p4)
}
   0xc   :  { %s545_s17 = smov 128   ;;  %s546_s18 = smov 8  }
   0xd   :  { %34 = dma.hbm_to_vmem [thread:$0]  %s597_s1, 2048, %s29_s13, [#allocation6], %s545_s17, %s545_s17, %s546_s18  }
   0xe   :  { %s485_s21 = scalar_lea.vmem %s17_s15, 2048  ;;  %p490_p6 = scmp.lt.s32.totalorder %s17_s15, %s17_s15 }
   0xf   :  { %p486_p5 = scmp.ne.s32.totalorder %s17_s15, %s485_s21  ;;  %p491_p7 = scmp.lt.s32.totalorder %s485_s21, %s485_s21 }
  0x11   :  { %p492_p8 = por %p491_p7, %p490_p6 }
  0x13   :  { %p493_p9 = pnand %p492_p8, %p486_p5 }
  0x15   :  { %496 = shalt.err (!%p493_p9)
}
  0x16   :  { %22 = dma.hbm_to_vmem [thread:$0]  %s596_s0, 2048, %s17_s15, [#allocation3], %s545_s17, %s545_s17, %s546_s18  }
  0x17   :  { %s547_s24 = smov [#allocation7]  }
  0x18   :  { %s40_s25 = sshll.u32 %s547_s24, 4  ;;  %s41_s25 = int_to_ptr.vmem [resolvable:$true] %s40_s25 }
  0x19   :  { %s505_s26 = scalar_lea.vmem %s41_s25, 2048  ;;  %p510_p11 = scmp.lt.s32.totalorder %s41_s25, %s41_s25 }
  0x1a   :  { %p506_p10 = scmp.ne.s32.totalorder %s41_s25, %s505_s26  ;;  %p511_p12 = scmp.lt.s32.totalorder %s505_s26, %s505_s26 }
  0x1c   :  { %p512_p13 = por %p511_p12, %p510_p11 }
  0x1e   :  { %p513_p0 = pnand %p512_p13, %p506_p10 }
  0x20   :  { %516 = shalt.err (!%p513_p0)
}
  0x21   :  { %46 = dma.hbm_to_vmem [thread:$0]  %s598_s2, 2048, %s41_s25, [#allocation6], %s545_s17, %s545_s17, %s546_s18  }
  0x22   :  { %537 = dma.done.wait [#allocation3], 2048  }
  0x23   :  { %538 = vsyncadd [#allocation3], 4294965248 }
  0x24   :  { %539 = dma.done.wait [#allocation6], 4096  }
  0x25   :  { %540 = vsyncadd [#allocation6], 4294963200  ;;  %v87_v0 = vld [vmem:[#allocation5 + $0x78] sm:$0xff]  ;;  %v86_v1 = vld [vmem:[#allocation5 + $0x70] sm:$0xff]  ;;  %s548_s0 = smov [#allocation8]  }
  0x26   :  { %363 = vmatprep.subr.mxu0 %v87_v0  ;;  %419 = vmatprep.subr.mxu1 %v87_v0  ;;  %v85_v2 = vld [vmem:[#allocation5 + $0x68] sm:$0xff]  ;;  %v56_v3 = vld [vmem:[#allocation2] sm:$0xff]  ;;  %v83_v7 = vld [vmem:[#allocation5 + $0x58] sm:$0xff]  ;;  %s318_s2 = sshll.u32 %s548_s0, 4  ;;  %s319_s2 = int_to_ptr.vmem [resolvable:$true] %s318_s2 }
  0x27   :  { %364 = vmatpush3.xpose.msra.mxu0 %v87_v0  ;;  %435 = vmatpush3.xpose.msra.mxu1 %v87_v0  ;;  %v64_v4 = vld [vmem:[#allocation2 + $0x40] sm:$0xff]  ;;  %v89_v8 = vld [vmem:[#allocation7 + $0x8] sm:$0xff]  ;;  %v82_v9 = vld [vmem:[#allocation5 + $0x50] sm:$0xff]  ;;  %s517_s28 = scalar_lea.vmem %s319_s2, 2048  ;;  %p522_p2 = scmp.lt.s32.totalorder %s319_s2, %s319_s2 }
  0x28   :  { %365 = vmatprep.subr.mxu0 %v86_v1  ;;  %420 = vmatprep.subr.mxu1 %v86_v1  ;;  %v84_v5 = vld [vmem:[#allocation5 + $0x60] sm:$0xff]  ;;  %v90_v10 = vld [vmem:[#allocation7 + $0x10] sm:$0xff]  ;;  %v81_v11 = vld [vmem:[#allocation5 + $0x48] sm:$0xff]  ;;  %p518_p1 = scmp.ne.s32.totalorder %s319_s2, %s517_s28  ;;  %p523_p3 = scmp.lt.s32.totalorder %s517_s28, %s517_s28 }
  0x29   :  { %395 = vmatprep.mubr.f32.mxu0 %v56_v3  ;;  %407 = vmatprep.mubr.f32.mxu1 %v64_v4  ;;  %v88_v6 = vld [vmem:[#allocation7] sm:$0xff]  ;;  %v91_v12 = vld [vmem:[#allocation7 + $0x18] sm:$0xff]  ;;  %v93_v16 = vld [vmem:[#allocation7 + $0x28] sm:$0xff] }
  0x2a   :  { %104 = vxpose.xlu0.b32.start [1/16] %v88_v6, 128  ;;  %v80_v13 = vld [vmem:[#allocation5 + $0x40] sm:$0xff]  ;;  %v79_v15 = vld [vmem:[#allocation5 + $0x38] sm:$0xff]  ;;  %v78_v17 = vld [vmem:[#allocation5 + $0x30] sm:$0xff]  ;;  %p524_p4 = por %p523_p3, %p522_p2 }
  0x2b   :  { %366 = vmatpush3.xpose.msra.mxu0 %v86_v1  ;;  %436 = vmatpush3.xpose.msra.mxu1 %v86_v1  ;;  %v92_v14 = vld [vmem:[#allocation7 + $0x20] sm:$0xff]  ;;  %v94_v18 = vld [vmem:[#allocation7 + $0x30] sm:$0xff]  ;;  %v77_v19 = vld [vmem:[#allocation5 + $0x28] sm:$0xff] }
  0x2c   :  { %367 = vmatprep.subr.mxu0 %v85_v2  ;;  %421 = vmatprep.subr.mxu1 %v85_v2  ;;  %v95_v20 = vld [vmem:[#allocation7 + $0x38] sm:$0xff]  ;;  %v76_v21 = vld [vmem:[#allocation5 + $0x20] sm:$0xff]  ;;  %v97_v24 = vld [vmem:[#allocation7 + $0x48] sm:$0xff]  ;;  %p525_p5 = pnand %p524_p4, %p518_p1 }
  0x2d   :  { %v96_v22 = vld [vmem:[#allocation7 + $0x40] sm:$0xff]  ;;  %v75_v23 = vld [vmem:[#allocation5 + $0x18] sm:$0xff]  ;;  %v74_v25 = vld [vmem:[#allocation5 + $0x10] sm:$0xff] }
  0x2e   :  { %105 = vxpose.xlu0.b32.cont [2/16] %v89_v8, 128  ;;  %v98_v26 = vld [vmem:[#allocation7 + $0x50] sm:$0xff]  ;;  %v73_v27 = vld [vmem:[#allocation5 + $0x8] sm:$0xff]  ;;  %v99_v28 = vld [vmem:[#allocation7 + $0x58] sm:$0xff] }
  0x2f   :  { %368 = vmatpush3.xpose.msra.mxu0 %v85_v2  ;;  %437 = vmatpush3.xpose.msra.mxu1 %v85_v2  ;;  %v72_v29 = vld [vmem:[#allocation5] sm:$0xff]  ;;  %v101_v31 = vld [vmem:[#allocation7 + $0x68] sm:$0xff]  ;;  %v58_v34 = vld [vmem:[#allocation2 + $0x10] sm:$0xff] }
  0x30   :  { %369 = vmatprep.subr.mxu0 %v84_v5  ;;  %422 = vmatprep.subr.mxu1 %v84_v5  ;;  %v100_v30 = vld [vmem:[#allocation7 + $0x60] sm:$0xff]  ;;  %v57_v32 = vld [vmem:[#allocation2 + $0x8] sm:$0xff]  ;;  %v66_v35 = vld [vmem:[#allocation2 + $0x50] sm:$0xff] }
  0x31   :  { %v65_v33 = vld [vmem:[#allocation2 + $0x48] sm:$0xff]  ;;  %v102_v36 = vld [vmem:[#allocation7 + $0x70] sm:$0xff]  ;;  %v59_v37 = vld [vmem:[#allocation2 + $0x18] sm:$0xff] }
  0x32   :  { %106 = vxpose.xlu0.b32.cont [3/16] %v90_v10, 128  ;;  %v67_v38 = vld [vmem:[#allocation2 + $0x58] sm:$0xff]  ;;  %v60_v39 = vld [vmem:[#allocation2 + $0x20] sm:$0xff]  ;;  %v61_v42 = vld [vmem:[#allocation2 + $0x28] sm:$0xff] }
  0x33   :  { %370 = vmatpush3.xpose.msra.mxu0 %v84_v5  ;;  %438 = vmatpush3.xpose.msra.mxu1 %v84_v5  ;;  %v68_v40 = vld [vmem:[#allocation2 + $0x60] sm:$0xff]  ;;  %v103_v41 = vld [vmem:[#allocation7 + $0x78] sm:$0xff]  ;;  %v69_v43 = vld [vmem:[#allocation2 + $0x68] sm:$0xff] }
  0x34   :  { %371 = vmatprep.subr.mxu0 %v83_v7  ;;  %423 = vmatprep.subr.mxu1 %v83_v7  ;;  %v62_v44 = vld [vmem:[#allocation2 + $0x30] sm:$0xff]  ;;  %v63_v46 = vld [vmem:[#allocation2 + $0x38] sm:$0xff] }
  0x35   :  { %v70_v45 = vld [vmem:[#allocation2 + $0x70] sm:$0xff]  ;;  %v71_v47 = vld [vmem:[#allocation2 + $0x78] sm:$0xff] }
  0x36   :  { %107 = vxpose.xlu0.b32.cont [4/16] %v91_v12, 128 }
  0x37   :  { %372 = vmatpush3.xpose.msra.mxu0 %v83_v7  ;;  %439 = vmatpush3.xpose.msra.mxu1 %v83_v7 }
  0x38   :  { %373 = vmatprep.subr.mxu0 %v82_v9  ;;  %424 = vmatprep.subr.mxu1 %v82_v9 }
  0x3a   :  { %108 = vxpose.xlu0.b32.cont [5/16] %v92_v14, 128 }
  0x3b   :  { %374 = vmatpush3.xpose.msra.mxu0 %v82_v9  ;;  %440 = vmatpush3.xpose.msra.mxu1 %v82_v9 }
  0x3c   :  { %375 = vmatprep.subr.mxu0 %v81_v11  ;;  %425 = vmatprep.subr.mxu1 %v81_v11 }
  0x3e   :  { %109 = vxpose.xlu0.b32.cont [6/16] %v93_v16, 128 }
  0x3f   :  { %376 = vmatpush3.xpose.msra.mxu0 %v81_v11  ;;  %441 = vmatpush3.xpose.msra.mxu1 %v81_v11 }
  0x40   :  { %377 = vmatprep.subr.mxu0 %v80_v13  ;;  %426 = vmatprep.subr.mxu1 %v80_v13 }
  0x42   :  { %110 = vxpose.xlu0.b32.cont [7/16] %v94_v18, 128 }
  0x43   :  { %378 = vmatpush3.xpose.msra.mxu0 %v80_v13  ;;  %442 = vmatpush3.xpose.msra.mxu1 %v80_v13 }
  0x44   :  { %379 = vmatprep.subr.mxu0 %v79_v15  ;;  %427 = vmatprep.subr.mxu1 %v79_v15 }
  0x46   :  { %111 = vxpose.xlu0.b32.cont [8/16] %v95_v20, 128 }
  0x47   :  { %380 = vmatpush3.xpose.msra.mxu0 %v79_v15  ;;  %443 = vmatpush3.xpose.msra.mxu1 %v79_v15 }
  0x48   :  { %381 = vmatprep.subr.mxu0 %v78_v17  ;;  %428 = vmatprep.subr.mxu1 %v78_v17 }
  0x4a   :  { %112 = vxpose.xlu0.b32.cont [9/16] %v96_v22, 128 }
  0x4b   :  { %382 = vmatpush3.xpose.msra.mxu0 %v78_v17  ;;  %444 = vmatpush3.xpose.msra.mxu1 %v78_v17 }
  0x4c   :  { %383 = vmatprep.subr.mxu0 %v77_v19  ;;  %429 = vmatprep.subr.mxu1 %v77_v19 }
  0x4e   :  { %113 = vxpose.xlu0.b32.cont [10/16] %v97_v24, 128 }
  0x4f   :  { %384 = vmatpush3.xpose.msra.mxu0 %v77_v19  ;;  %445 = vmatpush3.xpose.msra.mxu1 %v77_v19 }
  0x50   :  { %385 = vmatprep.subr.mxu0 %v76_v21  ;;  %430 = vmatprep.subr.mxu1 %v76_v21 }
  0x52   :  { %114 = vxpose.xlu0.b32.cont [11/16] %v98_v26, 128 }
  0x53   :  { %386 = vmatpush3.xpose.msra.mxu0 %v76_v21  ;;  %446 = vmatpush3.xpose.msra.mxu1 %v76_v21 }
  0x54   :  { %387 = vmatprep.subr.mxu0 %v75_v23  ;;  %431 = vmatprep.subr.mxu1 %v75_v23 }
  0x56   :  { %115 = vxpose.xlu0.b32.cont [12/16] %v99_v28, 128 }
  0x57   :  { %388 = vmatpush3.xpose.msra.mxu0 %v75_v23  ;;  %447 = vmatpush3.xpose.msra.mxu1 %v75_v23 }
  0x58   :  { %389 = vmatprep.subr.mxu0 %v74_v25  ;;  %432 = vmatprep.subr.mxu1 %v74_v25 }
  0x5a   :  { %116 = vxpose.xlu0.b32.cont [13/16] %v100_v30, 128 }
  0x5b   :  { %390 = vmatpush3.xpose.msra.mxu0 %v74_v25  ;;  %448 = vmatpush3.xpose.msra.mxu1 %v74_v25 }
  0x5c   :  { %391 = vmatprep.subr.mxu0 %v73_v27  ;;  %433 = vmatprep.subr.mxu1 %v73_v27 }
  0x5e   :  { %117 = vxpose.xlu0.b32.cont [14/16] %v101_v31, 128 }
  0x5f   :  { %392 = vmatpush3.xpose.msra.mxu0 %v73_v27  ;;  %449 = vmatpush3.xpose.msra.mxu1 %v73_v27 }
  0x60   :  { %393 = vmatprep.subr.mxu0 %v72_v29  ;;  %434 = vmatprep.subr.mxu1 %v72_v29 }
  0x62   :  { %118 = vxpose.xlu0.b32.cont [15/16] %v102_v36, 128 }
  0x63   :  { %394 = vmatpush3.xpose.msra.mxu0 %v72_v29  ;;  %450 = vmatpush3.xpose.msra.mxu1 %v72_v29 }
  0x66   :  { %396 = vmatmul.mubr.f32.vlgmr.msra.gmra.mxu0 %v57_v32  ;;  %408 = vmatmul.mubr.f32.vlgmr.msra.gmra.mxu1 %v65_v33 }
  0x67   :  { %398 = vmatprep.mubr.f32.mxu0 %v58_v34  ;;  %410 = vmatprep.mubr.f32.mxu1 %v66_v35 }
  0x68   :  { %119 = vxpose.xlu0.b32.end [16/16] %v103_v41, 128 }
  0x6a   :  { %399 = vmatmul.mubr.f32.gmra.mxu0 %v59_v37  ;;  %411 = vmatmul.mubr.f32.gmra.mxu1 %v67_v38 }
  0x6b   :  { %401 = vmatprep.mubr.f32.mxu0 %v60_v39  ;;  %413 = vmatprep.mubr.f32.mxu1 %v68_v40 }
  0x6e   :  { %402 = vmatmul.mubr.f32.gmra.mxu0 %v61_v42  ;;  %414 = vmatmul.mubr.f32.gmra.mxu1 %v69_v43 }
  0x6f   :  { %404 = vmatprep.mubr.f32.mxu0 %v62_v44  ;;  %416 = vmatprep.mubr.f32.mxu1 %v70_v45 }
  0x72   :  { %405 = vmatmul.mubr.f32.gmra.mxu0 %v63_v46  ;;  %417 = vmatmul.mubr.f32.gmra.mxu1 %v71_v47 }
  0xa8   :  { %v120_v48 = vpop.trf.xlu0 }
  0xac   :  { %v121_v49 = vpop.trf.xlu0 }
  0xb0   :  { %v122_v50 = vpop.trf.xlu0 }
  0xb4   :  { %v123_v51 = vpop.trf.xlu0 }
  0xb8   :  { %v124_v52 = vpop.trf.xlu0 }
  0xbc   :  { %v125_v53 = vpop.trf.xlu0 }
  0xc0   :  { %v587_v54 = vpop.trf.xlu0 }
  0xc4   :  { %v127_v55 = vpop.trf.xlu0 }
  0xc8   :  { %v128_v56 = vpop.trf.xlu0 }
  0xcc   :  { %v129_v57 = vpop.trf.xlu0 }
  0xd0   :  { %v130_v58 = vpop.trf.xlu0 }
  0xd4   :  { %v131_v59 = vpop.trf.xlu0 }
  0xd8   :  { %v132_v60 = vpop.trf.xlu0 }
  0xdc   :  { %v133_v61 = vpop.trf.xlu0 }
  0xe0   :  { %v134_v8 = vpop.trf.xlu0 }
  0xe4   :  { %v135_v27 = vpop.trf.xlu0 }
 0x126   :  { %v397_v62 = vpop.f32.mrf.mxu0  ;;  %v409_v63 = vpop.f32.mrf.mxu1 }
 0x127   :  { %v208_v0 = vadd.f32 %v397_v62, %v121_v49  ;;  %v248_v1 = vadd.f32 %v409_v63, %v129_v57 }
 0x128   :  { %v202_v2 = vpop.f32.mrf.mxu0  ;;  %v242_v3 = vpop.f32.mrf.mxu1 }
 0x129   :  { %v282_v4 = vmax.f32 %v208_v0, 0.0  ;;  %v290_v5 = vmax.f32 %v248_v1, 0.0  ;;  %v203_v6 = vadd.f32 %v202_v2, %v120_v48  ;;  %v243_v7 = vadd.f32 %v242_v3, %v128_v56 }
 0x12a   :  { %v400_v9 = vpop.f32.mrf.mxu0  ;;  %v412_v10 = vpop.f32.mrf.mxu1 }
 0x12b   :  { %298 = vst [vmem:[#allocation8 + $0x8] sm:$0xff] %v282_v4  ;;  %306 = vst [vmem:[#allocation8 + $0x48] sm:$0xff] %v290_v5  ;;  %v281_v11 = vmax.f32 %v203_v6, 0.0  ;;  %v289_v12 = vmax.f32 %v243_v7, 0.0  ;;  %v218_v13 = vadd.f32 %v400_v9, %v123_v51  ;;  %v258_v14 = vadd.f32 %v412_v10, %v131_v59 }
 0x12c   :  { %v212_v15 = vpop.f32.mrf.mxu0  ;;  %v252_v16 = vpop.f32.mrf.mxu1 }
 0x12d   :  { %297 = vst [vmem:[#allocation8] sm:$0xff] %v281_v11  ;;  %305 = vst [vmem:[#allocation8 + $0x40] sm:$0xff] %v289_v12  ;;  %v284_v17 = vmax.f32 %v218_v13, 0.0  ;;  %v292_v18 = vmax.f32 %v258_v14, 0.0  ;;  %v213_v19 = vadd.f32 %v212_v15, %v122_v50  ;;  %v253_v20 = vadd.f32 %v252_v16, %v130_v58 }
 0x12e   :  { %v403_v21 = vpop.f32.mrf.mxu0  ;;  %v415_v22 = vpop.f32.mrf.mxu1 }
 0x12f   :  { %300 = vst [vmem:[#allocation8 + $0x18] sm:$0xff] %v284_v17  ;;  %308 = vst [vmem:[#allocation8 + $0x58] sm:$0xff] %v292_v18  ;;  %v283_v23 = vmax.f32 %v213_v19, 0.0  ;;  %v291_v24 = vmax.f32 %v253_v20, 0.0  ;;  %v228_v25 = vadd.f32 %v403_v21, %v125_v53  ;;  %v268_v26 = vadd.f32 %v415_v22, %v133_v61 }
 0x130   :  { %v222_v28 = vpop.f32.mrf.mxu0  ;;  %v262_v29 = vpop.f32.mrf.mxu1 }
 0x131   :  { %299 = vst [vmem:[#allocation8 + $0x10] sm:$0xff] %v283_v23  ;;  %307 = vst [vmem:[#allocation8 + $0x50] sm:$0xff] %v291_v24  ;;  %v286_v30 = vmax.f32 %v228_v25, 0.0  ;;  %v294_v31 = vmax.f32 %v268_v26, 0.0  ;;  %v223_v32 = vadd.f32 %v222_v28, %v124_v52  ;;  %v263_v33 = vadd.f32 %v262_v29, %v132_v60 }
 0x132   :  { %v406_v34 = vpop.f32.mrf.mxu0  ;;  %v418_v35 = vpop.f32.mrf.mxu1 }
 0x133   :  { %302 = vst [vmem:[#allocation8 + $0x28] sm:$0xff] %v286_v30  ;;  %310 = vst [vmem:[#allocation8 + $0x68] sm:$0xff] %v294_v31  ;;  %v285_v36 = vmax.f32 %v223_v32, 0.0  ;;  %v293_v37 = vmax.f32 %v263_v33, 0.0  ;;  %v238_v38 = vadd.f32 %v406_v34, %v127_v55  ;;  %v278_v39 = vadd.f32 %v418_v35, %v135_v27 }
 0x134   :  { %v232_v40 = vpop.f32.mrf.mxu0  ;;  %v272_v41 = vpop.f32.mrf.mxu1 }
 0x135   :  { %301 = vst [vmem:[#allocation8 + $0x20] sm:$0xff] %v285_v36  ;;  %309 = vst [vmem:[#allocation8 + $0x60] sm:$0xff] %v293_v37  ;;  %v288_v42 = vmax.f32 %v238_v38, 0.0  ;;  %v296_v43 = vmax.f32 %v278_v39, 0.0  ;;  %v233_v44 = vadd.f32 %v232_v40, %v587_v54  ;;  %v273_v45 = vadd.f32 %v272_v41, %v134_v8 }
 0x137   :  { %304 = vst [vmem:[#allocation8 + $0x38] sm:$0xff] %v288_v42  ;;  %312 = vst [vmem:[#allocation8 + $0x78] sm:$0xff] %v296_v43  ;;  %v287_v46 = vmax.f32 %v233_v44, 0.0  ;;  %v295_v47 = vmax.f32 %v273_v45, 0.0 }
 0x139   :  { %303 = vst [vmem:[#allocation8 + $0x30] sm:$0xff] %v287_v46  ;;  %311 = vst [vmem:[#allocation8 + $0x70] sm:$0xff] %v295_v47 }
 0x13a   :  { %528 = shalt.err (!%p525_p5)
}
 0x13b   :  { %324 = dma.vmem_to_hbm [thread:$0]  %s319_s2, 2048, %s599_s3, [#allocation4], %s545_s17, %s545_s17, %s546_s18  }
 0x13c   :  { %541 = dma.done.wait [#allocation4], 2048  }
 0x13d   :  { %542 = vsyncadd [#allocation4], 4294965248 }
 0x13e   :  { %328 = vsyncpa [#allocation3], 1 }
 0x13f   :  { %329 = vsyncpa [#allocation6], 1 }
 0x140   :  { %330 = vsyncpa [#allocation4], 1 }

</bundles_post_ra>
